<compile_context>
chip_gen: v7x
topology: tpu7x:2x2x1
jax: 0.10.0
libtpu: 0.0.40
codegen_flags: <defaults>
</compile_context>

<pallas_src>
import functools
import numpy as np

import jax
import jax.numpy as jnp
from jax.experimental import pallas as pl
from jax.experimental.pallas import tpu as pltpu


# dtype fed to the MXU for the per-step adjacency / node-feature operands.
# float32 reproduces the PyTorch reference numerics exactly; flip to
# jnp.bfloat16 for large knowledge graphs (0/1 adjacency is exact in bf16,
# halves DMA bytes, doubles MXU throughput on v6e/v7x).  Accumulation stays
# f32 via preferred_element_type either way.
COMPUTE_DTYPE = jnp.float32

_LANE = 128
_SUBLANE = 8


# ----------------------------------------------------------------------------
# helpers
# ----------------------------------------------------------------------------
def _full_spec(shape):
    nd = len(shape)
    return pl.BlockSpec(shape, lambda *_: (0,) * nd)


_SMEM_SPEC = pl.BlockSpec(memory_space=pltpu.MemorySpace.SMEM)


def _round_up(n, m):
    return ((n + m - 1) // m) * m


def _bucket(n, minimum=32):
    """Power-of-two node-count buckets: every step re-uses the same compiled
    kernel instead of recompiling each time current_idx grows by one node."""
    b = max(minimum, _SUBLANE)
    while b < n:
        b <<= 1
    return b


# ----------------------------------------------------------------------------
# Pallas kernels
# ----------------------------------------------------------------------------
def _sg_kernel(adj_ref, emb_ref, w_ref, b_ref, o_ref):
    """SG_net + scene-graph propagation fused: SG_adj @ (SG_emb @ W + b)."""
    h = (jnp.dot(emb_ref[...], w_ref[...], preferred_element_type=jnp.float32)
         + b_ref[...])
    o_ref[...] = jnp.dot(adj_ref[...], h, preferred_element_type=jnp.float32)


def _step_kernel(scal_ref, adj_ref, x_ref, *refs, n_layers):
    """One full GSNN search step, fused:
         h   = GCN(adj, x)                 (all layers, relu between)
         imp = sigmoid((adj @ h) @ w + b)  (importance head, stays in vregs)
       and the three scalar reductions the host loop needs:
         out[0] = max(imp[:n_active])
         out[1] = max(imp[n_active:n_total])
         out[2] = argmax(imp[n_active:n_total])   (as float)
    """
    out_ref = refs[-1]
    wb = refs[: 2 * n_layers]
    w_imp = refs[2 * n_layers]
    b_imp = refs[2 * n_layers + 1]

    adj = adj_ref[...]
    h = x_ref[...]
    for i in range(n_layers):
        h = jnp.dot(adj, h, preferred_element_type=jnp.float32)
        h = (jnp.dot(h, wb[2 * i][...], preferred_element_type=jnp.float32)
             + wb[2 * i + 1][...])
        if i < n_layers - 1:
            h = jnp.maximum(h, 0.0)

    m = jnp.dot(adj, h, preferred_element_type=jnp.float32)
    s = jnp.dot(m, w_imp[...], preferred_element_type=jnp.float32) + b_imp[...]
    imp = jax.nn.sigmoid(s)                                  # (N_pad, 1)

    n_act = scal_ref[0]
    n_tot = scal_ref[1]
    rows = jax.lax.broadcasted_iota(jnp.int32, imp.shape, 0)
    neg = jnp.float32(-jnp.inf)
    act_mask = rows < n_act
    nbr_mask = jnp.logical_and(rows >= n_act, rows < n_tot)

    masked_nbr = jnp.where(nbr_mask, imp, neg)
    max_act = jnp.max(jnp.where(act_mask, imp, neg))
    max_nbr = jnp.max(masked_nbr)
    best_row = jnp.min(jnp.where(masked_nbr == max_nbr, rows, jnp.int32(2 ** 30)))

    out_ref[0] = max_act
    out_ref[1] = max_nbr
    out_ref[2] = (best_row - n_act).astype(jnp.float32)


def _final_kernel(adj_ref, x_ref, img_ref, *refs, n_layers):
    """Final step fused: GCN layers + image-conditioned importance
       sigmoid((adj @ h) @ W + img @ W_img + b) with a lane-dense (N, 128) output
       (class dim zero-padded to 128; caller slices)."""
    out_ref = refs[-1]
    wb = refs[: 2 * n_layers]
    w_imp = refs[2 * n_layers]
    w_img = refs[2 * n_layers + 1]
    b_imp = refs[2 * n_layers + 2]

    adj = adj_ref[...]
    h = x_ref[...]
    for i in range(n_layers):
        h = jnp.dot(adj, h, preferred_element_type=jnp.float32)
        h = (jnp.dot(h, wb[2 * i][...], preferred_element_type=jnp.float32)
             + wb[2 * i + 1][...])
        if i < n_layers - 1:
            h = jnp.maximum(h, 0.0)

    m = jnp.dot(adj, h, preferred_element_type=jnp.float32)
    s = (jnp.dot(m, w_imp[...], preferred_element_type=jnp.float32)
         + jnp.dot(img_ref[...], w_img[...], preferred_element_type=jnp.float32)
         + b_imp[...])
    out_ref[...] = jax.nn.sigmoid(s)


# ----------------------------------------------------------------------------
# jitted device wrappers (compile once per shape bucket)
# ----------------------------------------------------------------------------
@jax.jit
def _prepare_x(x, SG_adj, SG_embeddings, sg_w, sg_b):
    """Fused SG_net + propagation, merge with KG features, and append one zero
    row used as the padding target for the per-step gathers."""
    n_sg = SG_adj.shape[0]
    n_pad = _round_up(max(n_sg, _SUBLANE), _SUBLANE)
    adj_p = jnp.zeros((n_pad, n_pad), jnp.float32).at[:n_sg, :n_sg].set(
        SG_adj.astype(jnp.float32))
    emb_p = jnp.zeros((n_pad, SG_embeddings.shape[1]), jnp.float32).at[:n_sg].set(
        SG_embeddings.astype(jnp.float32))
    b2 = sg_b.reshape(1, -1)

    sg = pl.pallas_call(
        _sg_kernel,
        out_shape=jax.ShapeDtypeStruct((n_pad, sg_w.shape[1]), jnp.float32),
        in_specs=[_full_spec(adj_p.shape), _full_spec(emb_p.shape),
                  _full_spec(sg_w.shape), _full_spec(b2.shape)],
        out_specs=_full_spec((n_pad, sg_w.shape[1])),
    )(adj_p, emb_p, sg_w, b2)[:n_sg]

    zero = jnp.zeros((1, x.shape[1]), jnp.float32)
    return jnp.concatenate([x.astype(jnp.float32), sg, zero], axis=0)


@jax.jit
def _fused_step(x_pad, adj_pad, idx, scal, gcn_wb, w_imp, b_imp):
    """Gather the padded sub-graph on device and run the fused step kernel.
    Returns a (3,) f32 array: [max(active), max(nbrs), argmax(nbrs)]."""
    n_layers = len(gcn_wb)
    x_sub = x_pad[idx].astype(COMPUTE_DTYPE)        # padded rows gather the zero row
    sub_adj = adj_pad[idx][:, idx]                  # padded rows/cols are zero

    operands = [scal, sub_adj, x_sub]
    in_specs = [_SMEM_SPEC, _full_spec(sub_adj.shape), _full_spec(x_sub.shape)]
    for w, b in gcn_wb:
        b2 = b.reshape(1, -1)
        operands += [w, b2]
        in_specs += [_full_spec(w.shape), _full_spec(b2.shape)]
    b_imp2 = b_imp.reshape(1, -1)
    operands += [w_imp, b_imp2]
    in_specs += [_full_spec(w_imp.shape), _full_spec(b_imp2.shape)]

    return pl.pallas_call(
        functools.partial(_step_kernel, n_layers=n_layers),
        out_shape=jax.ShapeDtypeStruct((3,), jnp.float32),
        in_specs=in_specs,
        out_specs=_SMEM_SPEC,
    )(*operands)


@jax.jit
def _fused_final(x_pad, adj_pad, idx, img_feat, gcn_wb, w_imp, w_img, b_imp):
    """Final fused step: GCN + image-conditioned importance, lane-dense output."""
    n_layers = len(gcn_wb)
    x_sub = x_pad[idx].astype(COMPUTE_DTYPE)
    sub_adj = adj_pad[idx][:, idx]
    n_pad = idx.shape[0]

    ncls = w_imp.shape[1]
    ncls_pad = _round_up(ncls, _LANE)               # lane-dense output slab
    w_imp_p = jnp.zeros((w_imp.shape[0], ncls_pad), jnp.float32).at[:, :ncls].set(w_imp)
    w_img_p = jnp.zeros((w_img.shape[0], ncls_pad), jnp.float32).at[:, :ncls].set(w_img)
    b_imp_p = jnp.zeros((1, ncls_pad), jnp.float32).at[:, :ncls].set(b_imp.reshape(1, -1))
    img2 = img_feat.reshape(1, -1)

    operands = [sub_adj, x_sub, img2]
    in_specs = [_full_spec(sub_adj.shape), _full_spec(x_sub.shape), _full_spec(img2.shape)]
    for w, b in gcn_wb:
        b2 = b.reshape(1, -1)
        operands += [w, b2]
        in_specs += [_full_spec(w.shape), _full_spec(b2.shape)]
    operands += [w_imp_p, w_img_p, b_imp_p]
    in_specs += [_full_spec(w_imp_p.shape), _full_spec(w_img_p.shape),
                 _full_spec(b_imp_p.shape)]

    return pl.pallas_call(
        functools.partial(_final_kernel, n_layers=n_layers),
        out_shape=jax.ShapeDtypeStruct((n_pad, ncls_pad), jnp.float32),
        in_specs=in_specs,
        out_specs=_full_spec((n_pad, ncls_pad)),
    )(*operands)


# ----------------------------------------------------------------------------
# host-side graph-search glue (numpy, data-dependent control flow)
# ----------------------------------------------------------------------------
def get_neighbour_nodes(adj_np, active_idx):
    act = set(int(i) for i in active_idx)
    nbrs = set()
    for i in act:
        nbrs |= set(np.nonzero(adj_np[i] > 0)[0].tolist())
    return sorted(nbrs - act)


def merge_adj(KG_adj_np, SG_adj_np, active_idx_init):
    """Block-diagonal merged adjacency; initial active KG nodes connected to all
    SG nodes; one trailing zero row/col is the padding target for gathers."""
    n_kg, n_sg = KG_adj_np.shape[0], SG_adj_np.shape[0]
    n = n_kg + n_sg
    adj = np.zeros((n + 1, n + 1), dtype=np.float32)
    adj[:n_kg, :n_kg] = KG_adj_np
    adj[n_kg:n, n_kg:n] = SG_adj_np
    for a in np.asarray(active_idx_init[0]):
        adj[int(a), n_kg:n] = 1.0
        adj[n_kg:n, int(a)] = 1.0
    return adj


def imgsnn_forward(params, config, KG_vocab, KG_nodes,
                   x, KG_adj, SG_adj, SG_embeddings, active_idx_init, img_feat):
    n_steps = config["gsnn"]["n_steps"]
    thr = config["gsnn"]["step_threshold"]
    ncls = config["vit"]["num_classes"]

    KG_adj_np = np.asarray(KG_adj, dtype=np.float32)
    SG_adj_np = np.asarray(SG_adj, dtype=np.float32)
    n_kg = KG_adj_np.shape[0]

    # SG_net + SG_adj propagation fused in one Pallas kernel; x_pad has one
    # trailing zero row used as the padding target for per-step gathers.
    x_pad = _prepare_x(x, SG_adj, SG_embeddings, params["sg_w"], params["sg_b"])

    adj_np = merge_adj(KG_adj_np, SG_adj_np, active_idx_init)   # host copy for search
    adj_dev = jnp.asarray(adj_np, dtype=COMPUTE_DTYPE)          # device copy for gathers
    pad_row = adj_np.shape[0] - 1                               # index of the zero row

    active_idx = np.asarray(active_idx_init[0], dtype=np.int64)
    objects = KG_nodes["objects"][0]

    def padded_index(current_idx):
        bucket = _bucket(len(current_idx))
        idx = np.full((bucket,), pad_row, dtype=np.int32)
        idx[: len(current_idx)] = current_idx
        return jnp.asarray(idx)

    # TODO(synk): vocab string-membership filtering and the data-dependent
    # top-1 / threshold graph search are host-side Python control flow (as in
    # the PyTorch original); only the dense per-step math runs on-device.
    # TODO(synk): for KGs with thousands of nodes, grid the adjacency over row
    # tiles (BlockSpec((tm, n), ...), dimension_semantics=("parallel",)) instead
    # of the single full-array block used here.
    for step in range(n_steps - 1):
        nbrs = get_neighbour_nodes(adj_np, active_idx)
        nbrs = [n for n in nbrs if n < n_kg]
        nbrs = np.array([n for n in nbrs if KG_vocab[n] in objects], dtype=np.int64)
        if nbrs.size == 0:
            # mirrors torch try/except on empty expansion; skip device work
            continue
        current_idx = np.concatenate([active_idx, nbrs])
        na, nt = len(active_idx), len(current_idx)
        stats = np.asarray(_fused_step(
            x_pad, adj_dev, padded_index(current_idx),
            np.array([na, nt], dtype=np.int32),
            tuple(params["gcns"][step]),
            params["imps"][step]["w"], params["imps"][step]["b"]))
        max_act, max_nbr, best = float(stats[0]), float(stats[1]), int(stats[2])
        if thr * max_act > max_nbr:
            break
        active_idx = np.concatenate([active_idx, nbrs[best:best + 1]])

    # final step: expand to non-object neighbours, image-conditioned importance
    nbrs = get_neighbour_nodes(adj_np, active_idx)
    nbrs = [n for n in nbrs if n < n_kg]
    nbrs = np.array([n for n in nbrs if KG_vocab[n] not in objects], dtype=np.int64)
    current_idx = np.concatenate([active_idx, nbrs]).astype(np.int64)
    na, nt = len(active_idx), len(current_idx)
    imp_full = _fused_final(
        x_pad, adj_dev, padded_index(current_idx), img_feat,
        tuple(params["gcns"][-1]),
        params["imps"][-1]["w"], params["imps"][-1]["wimg"], params["imps"][-1]["b"])
    imp = imp_full[:nt, :ncls]
    return imp, current_idx[na:]


# ----------------------------------------------------------------------------
# deterministic parameter / input construction
# ----------------------------------------------------------------------------
def init_params(key, config):
    nfeat = config["gcn"]["n_feat"]
    nhid = config["gcn"]["n_hid"]
    nout = config["gcn"]["n_out"]
    n_layers = config["gcn"]["n_layers"]
    n_steps = config["gsnn"]["n_steps"]
    img_dim = config["vit"]["img_dim"]
    ncls = config["vit"]["num_classes"]

    keys = iter(jax.random.split(key, 256))

    def dense(din, dout, scale=0.05):
        w = scale * jax.random.normal(next(keys), (din, dout), jnp.float32)
        b = scale * jax.random.normal(next(keys), (dout,), jnp.float32)
        return w, b

    dims = [nfeat] + [nhid] * (n_layers - 1) + [nout]
    gcns = []
    for _ in range(n_steps):
        gcns.append([dense(dims[i], dims[i + 1]) for i in range(n_layers)])

    imps = []
    for _ in range(n_steps - 1):
        w, b = dense(nout, 1)
        imps.append({"w": w, "b": b})
    w, b = dense(nout, ncls)
    wimg, _ = dense(img_dim, ncls)
    imps.append({"w": w, "wimg": wimg, "b": b})

    sg_w, sg_b = dense(768, nfeat)
    return {"gcns": gcns, "imps": imps, "sg_w": sg_w, "sg_b": sg_b}


if __name__ == "__main__":
    config = {
        "gcn": {"n_feat": 32, "n_hid": 32, "n_out": 32,
                "dropout": 0.0, "n_layers": 2, "image_conditioning": True},
        "gsnn": {"n_steps": 3, "step_threshold": 0.5},
        "vit": {"img_dim": 32, "num_classes": 8},
    }

    N_KG, N_SG = 16, 4
    KG_vocab = [f"node{i}" for i in range(N_KG)]
    KG_nodes = {"objects": [set(f"node{i}" for i in range(0, N_KG, 2))]}

    key = jax.random.PRNGKey(0)
    k_param, k_x, k_sg, k_img, k_kgadj, k_sgadj = jax.random.split(key, 6)

    params = init_params(k_param, config)

    x = jax.random.normal(k_x, (N_KG, config["gcn"]["n_feat"]), jnp.float32)
    SG_embeddings = jax.random.normal(k_sg, (N_SG, 768), jnp.float32)
    img_feat = jax.random.normal(k_img, (config["vit"]["img_dim"],), jnp.float32)

    kg_adj_np = np.asarray(
        jax.random.bernoulli(k_kgadj, 0.35, (N_KG, N_KG))).astype(np.float32)
    kg_adj_np = np.clip(kg_adj_np + kg_adj_np.T + np.eye(N_KG, dtype=np.float32), 0, 1)
    sg_adj_np = np.asarray(
        jax.random.bernoulli(k_sgadj, 0.6, (N_SG, N_SG))).astype(np.float32)
    sg_adj_np = np.clip(sg_adj_np + sg_adj_np.T + np.eye(N_SG, dtype=np.float32), 0, 1)
    KG_adj = jnp.asarray(kg_adj_np)
    SG_adj = jnp.asarray(sg_adj_np)

    active_idx_init = [np.array([0, 3], dtype=np.int64)]

    imp, expanded_idx = imgsnn_forward(
        params, config, KG_vocab, KG_nodes,
        x, KG_adj, SG_adj, SG_embeddings, active_idx_init, img_feat)

    jax.block_until_ready(imp)
    assert imp.shape[1] == config["vit"]["num_classes"]
    print("KERNEL_OK")
</pallas_src>

<mosaic_0001>
module attributes {stable_mosaic.version = 11 : i64} {
  func.func @_sg_kernel(%arg0: memref<8x8xf32, #tpu.memory_space<vmem>>, %arg1: memref<8x768xf32, #tpu.memory_space<vmem>>, %arg2: memref<768x32xf32, #tpu.memory_space<vmem>>, %arg3: memref<1x32xf32, #tpu.memory_space<vmem>>, %arg4: memref<8x32xf32, #tpu.memory_space<vmem>>) attributes {dimension_semantics = [], scalar_prefetch = 0 : i64, scratch_operands = 0 : i64, tpu.core_type = #tpu.core_type<tc>} {
    %c0 = arith.constant 0 : index
    %c0_0 = arith.constant 0 : index
    %0 = vector.load %arg1[%c0, %c0_0] : memref<8x768xf32, #tpu.memory_space<vmem>>, vector<8x768xf32>
    %c0_1 = arith.constant 0 : index
    %c0_2 = arith.constant 0 : index
    %1 = vector.load %arg2[%c0_1, %c0_2] : memref<768x32xf32, #tpu.memory_space<vmem>>, vector<768x32xf32>
    %cst = arith.constant dense<0.000000e+00> : vector<8x32xf32>
    %2 = tpu.matmul %0, %1, %cst {dimension_numbers = #tpu.dot_dimension_numbers<[1], [0], [0], [1], [0, 0, 1, 1], [], []>} : vector<8x768xf32>, vector<768x32xf32>, vector<8x32xf32> -> vector<8x32xf32>
    %c0_3 = arith.constant 0 : index
    %c0_4 = arith.constant 0 : index
    %3 = vector.load %arg3[%c0_3, %c0_4] : memref<1x32xf32, #tpu.memory_space<vmem>>, vector<1x32xf32>
    %4 = vector.broadcast %3 : vector<1x32xf32> to vector<8x32xf32>
    %5 = arith.addf %2, %4 : vector<8x32xf32>
    %c0_5 = arith.constant 0 : index
    %c0_6 = arith.constant 0 : index
    %6 = vector.load %arg0[%c0_5, %c0_6] : memref<8x8xf32, #tpu.memory_space<vmem>>, vector<8x8xf32>
    %cst_7 = arith.constant dense<0.000000e+00> : vector<8x32xf32>
    %7 = tpu.matmul %6, %5, %cst_7 {dimension_numbers = #tpu.dot_dimension_numbers<[1], [0], [0], [1], [0, 0, 1, 1], [], []>} : vector<8x8xf32>, vector<8x32xf32>, vector<8x32xf32> -> vector<8x32xf32>
    %c0_8 = arith.constant 0 : index
    %c0_9 = arith.constant 0 : index
    %8 = vector.load %arg4[%c0_8, %c0_9] : memref<8x32xf32, #tpu.memory_space<vmem>>, vector<8x32xf32>
    tpu.vector_store %arg4[%c0_8, %c0_9], %7 {strides = array<i32>} : memref<8x32xf32, #tpu.memory_space<vmem>>, vector<8x32xf32>,
    return
  }
}

</mosaic_0001>

<bundles_post_ra>
// kernel: _prepare_x.1
= control target key start
LH: loop header
LB: loop body
LE: loop exit
PB: predicated region body
PF: predicated region fallthrough
CT: control target
= control target key end

     0   :  { %vm630_vm0 = vmmov 0   ;;  %vm337_vm1 = vcmask 64512   ;;  %vm411_vm2 = vcmask 261120   ;;  %s971_s2 = inlined_call_operand.vmem [shape: f32[768,32], index: 2, kind: input, shape index: {}]   ;;  %s972_s1 = inlined_call_operand.vmem [shape: f32[8,768], index: 1, kind: input, shape index: {}]   ;;  %s973_s3 = inlined_call_operand.vmem [shape: f32[1,32], index: 3, kind: input, shape index: {}]   ;;  %s974_s0 = inlined_call_operand.vmem [shape: f32[8,8], index: 0, kind: input, shape index: {}]   ;;  %s975_s4 = inlined_call_operand.vmem [shape: f32[8,32], index: 4, kind: output, shape index: {}]  }
   0x1   :  { %v39_v0 = vld [vmem:[%s971_s2 + $0x80] sm:$0xff]  ;;  %v40_v1 = vld [vmem:[%s971_s2 + $0x88] sm:$0xff]  ;;  %v41_v11 = vld [vmem:[%s971_s2 + $0x90] sm:$0xff] }
   0x2   :  { %v23_v2 = vld [vmem:[%s971_s2] sm:$0xff]  ;;  %v531_v3 = vpack.c.bf16 %v40_v1, %v39_v0  ;;  %v24_v4 = vld [vmem:[%s971_s2 + $0x8] sm:$0xff]  ;;  %v42_v13 = vld [vmem:[%s971_s2 + $0x98] sm:$0xff] }
   0x3   :  { %v71_v5 = vld [vmem:[%s971_s2 + $0x180] sm:$0xff]  ;;  %v72_v6 = vld [vmem:[%s971_s2 + $0x188] sm:$0xff]  ;;  %v533_v7 = vpack.c.bf16 %v24_v4, %v23_v2  ;;  %v25_v14 = vld [vmem:[%s971_s2 + $0x10] sm:$0xff]  ;;  %v535_v16 = vpack.c.bf16 %v42_v13, %v41_v11 }
   0x4   :  { %v563_v8 = vpack.c.bf16 %v72_v6, %v71_v5  ;;  %v55_v9 = vld [vmem:[%s971_s2 + $0x100] sm:$0xff]  ;;  %v56_v10 = vld [vmem:[%s971_s2 + $0x108] sm:$0xff]  ;;  %532 = vmatprep.subr.bf16.mxu0 %v531_v3  ;;  %v26_v15 = vld [vmem:[%s971_s2 + $0x18] sm:$0xff] }
   0x5   :  { %v565_v12 = vpack.c.bf16 %v56_v10, %v55_v9  ;;  %534 = vmatpush3.bf16.msra.mxu0 %v533_v7  ;;  %v537_v17 = vpack.c.bf16 %v26_v15, %v25_v14  ;;  %v73_v18 = vld [vmem:[%s971_s2 + $0x190] sm:$0xff]  ;;  %v74_v19 = vld [vmem:[%s971_s2 + $0x198] sm:$0xff]  ;;  %v43_v23 = vld [vmem:[%s971_s2 + $0xa0] sm:$0xff] }
   0x6   :  { %564 = vmatprep.subr.bf16.mxu1 %v563_v8  ;;  %v57_v20 = vld [vmem:[%s971_s2 + $0x110] sm:$0xff]  ;;  %v567_v21 = vpack.c.bf16 %v74_v19, %v73_v18  ;;  %v58_v22 = vld [vmem:[%s971_s2 + $0x118] sm:$0xff]  ;;  %v44_v24 = vld [vmem:[%s971_s2 + $0xa8] sm:$0xff]  ;;  %536 = vmatprep.subr.bf16.mxu0 %v535_v16 }
   0x7   :  { %566 = vmatpush3.bf16.msra.mxu1 %v565_v12  ;;  %v569_v25 = vpack.c.bf16 %v58_v22, %v57_v20  ;;  %v539_v26 = vpack.c.bf16 %v44_v24, %v43_v23  ;;  %v27_v27 = vld [vmem:[%s971_s2 + $0x20] sm:$0xff]  ;;  %v28_v28 = vld [vmem:[%s971_s2 + $0x28] sm:$0xff]  ;;  %v45_v35 = vld [vmem:[%s971_s2 + $0xb0] sm:$0xff] }
   0x8   :  { %v75_v29 = vld [vmem:[%s971_s2 + $0x1a0] sm:$0xff]  ;;  %568 = vmatprep.subr.bf16.mxu1 %v567_v21  ;;  %v76_v30 = vld [vmem:[%s971_s2 + $0x1a8] sm:$0xff]  ;;  %v541_v33 = vpack.c.bf16 %v28_v28, %v27_v27  ;;  %v46_v36 = vld [vmem:[%s971_s2 + $0xb8] sm:$0xff] }
   0x9   :  { %v59_v31 = vld [vmem:[%s971_s2 + $0x120] sm:$0xff]  ;;  %v60_v32 = vld [vmem:[%s971_s2 + $0x128] sm:$0xff]  ;;  %538 = vmatpush3.bf16.msra.mxu0 %v537_v17  ;;  %v571_v34 = vpack.c.bf16 %v76_v30, %v75_v29  ;;  %v29_v37 = vld [vmem:[%s971_s2 + $0x30] sm:$0xff]  ;;  %v543_v39 = vpack.c.bf16 %v46_v36, %v45_v35 }
   0xa   :  { %540 = vmatprep.subr.bf16.mxu0 %v539_v26  ;;  %v573_v38 = vpack.c.bf16 %v60_v32, %v59_v31  ;;  %v30_v40 = vld [vmem:[%s971_s2 + $0x38] sm:$0xff]  ;;  %v77_v41 = vld [vmem:[%s971_s2 + $0x1b0] sm:$0xff]  ;;  %v47_v46 = vld [vmem:[%s971_s2 + $0xc0] sm:$0xff] }
   0xb   :  { %570 = vmatpush3.bf16.msra.mxu1 %v569_v25  ;;  %v78_v42 = vld [vmem:[%s971_s2 + $0x1b8] sm:$0xff]  ;;  %v61_v44 = vld [vmem:[%s971_s2 + $0x130] sm:$0xff]  ;;  %v48_v47 = vld [vmem:[%s971_s2 + $0xc8] sm:$0xff]  ;;  %v545_v48 = vpack.c.bf16 %v30_v40, %v29_v37 }
   0xc   :  { %572 = vmatprep.subr.bf16.mxu1 %v571_v34  ;;  %v575_v43 = vpack.c.bf16 %v78_v42, %v77_v41  ;;  %v62_v45 = vld [vmem:[%s971_s2 + $0x138] sm:$0xff]  ;;  %v79_v49 = vld [vmem:[%s971_s2 + $0x1c0] sm:$0xff]  ;;  %v80_v50 = vld [vmem:[%s971_s2 + $0x1c8] sm:$0xff]  ;;  %v547_v52 = vpack.c.bf16 %v48_v47, %v47_v46 }
   0xd   :  { %542 = vmatpush3.bf16.msra.mxu0 %v541_v33  ;;  %v577_v51 = vpack.c.bf16 %v62_v45, %v61_v44  ;;  %v31_v53 = vld [vmem:[%s971_s2 + $0x40] sm:$0xff]  ;;  %v32_v54 = vld [vmem:[%s971_s2 + $0x48] sm:$0xff]  ;;  %v579_v56 = vpack.c.bf16 %v80_v50, %v79_v49  ;;  %v49_v58 = vld [vmem:[%s971_s2 + $0xd0] sm:$0xff] }
   0xe   :  { %544 = vmatprep.subr.bf16.mxu0 %v543_v39  ;;  %v63_v55 = vld [vmem:[%s971_s2 + $0x140] sm:$0xff]  ;;  %v64_v57 = vld [vmem:[%s971_s2 + $0x148] sm:$0xff]  ;;  %v50_v59 = vld [vmem:[%s971_s2 + $0xd8] sm:$0xff]  ;;  %v549_v62 = vpack.c.bf16 %v32_v54, %v31_v53 }
   0xf   :  { %574 = vmatpush3.bf16.msra.mxu1 %v573_v38  ;;  %v81_v60 = vld [vmem:[%s971_s2 + $0x1d0] sm:$0xff]  ;;  %v82_v61 = vld [vmem:[%s971_s2 + $0x1d8] sm:$0xff]  ;;  %v581_v63 = vpack.c.bf16 %v64_v57, %v63_v55  ;;  %v551_v0 = vpack.c.bf16 %v50_v59, %v49_v58  ;;  %v51_v6 = vld [vmem:[%s971_s2 + $0xe0] sm:$0xff] }
  0x10   :  { %576 = vmatprep.subr.bf16.mxu1 %v575_v43  ;;  %v33_v1 = vld [vmem:[%s971_s2 + $0x50] sm:$0xff]  ;;  %v34_v2 = vld [vmem:[%s971_s2 + $0x58] sm:$0xff]  ;;  %v583_v4 = vpack.c.bf16 %v82_v61, %v81_v60  ;;  %v52_v7 = vld [vmem:[%s971_s2 + $0xe8] sm:$0xff] }
  0x11   :  { %546 = vmatpush3.bf16.msra.mxu0 %v545_v48  ;;  %v65_v3 = vld [vmem:[%s971_s2 + $0x150] sm:$0xff]  ;;  %v66_v5 = vld [vmem:[%s971_s2 + $0x158] sm:$0xff]  ;;  %v83_v8 = vld [vmem:[%s971_s2 + $0x1e0] sm:$0xff]  ;;  %v553_v10 = vpack.c.bf16 %v34_v2, %v33_v1  ;;  %v555_v14 = vpack.c.bf16 %v52_v7, %v51_v6 }
  0x12   :  { %548 = vmatprep.subr.bf16.mxu0 %v547_v52  ;;  %v84_v9 = vld [vmem:[%s971_s2 + $0x1e8] sm:$0xff]  ;;  %v35_v11 = vld [vmem:[%s971_s2 + $0x60] sm:$0xff]  ;;  %v585_v13 = vpack.c.bf16 %v66_v5, %v65_v3  ;;  %v53_v19 = vld [vmem:[%s971_s2 + $0xf0] sm:$0xff] }
  0x13   :  { %578 = vmatpush3.bf16.msra.mxu1 %v577_v51  ;;  %v18_v12 = vld [vmem:[%s972_s1 + $0x8] sm:$0xff]  ;;  %v67_v16 = vld [vmem:[%s971_s2 + $0x160] sm:$0xff]  ;;  %v587_v18 = vpack.c.bf16 %v84_v9, %v83_v8  ;;  %v54_v20 = vld [vmem:[%s971_s2 + $0xf8] sm:$0xff] }
  0x14   :  { %580 = vmatprep.subr.bf16.mxu1 %v579_v56  ;;  %v36_v15 = vld [vmem:[%s971_s2 + $0x68] sm:$0xff]  ;;  %190 = vmatprep.mubr.f32.mxu0 %v18_v12  ;;  %v20_v21 = vld [vmem:[%s972_s1 + $0x18] sm:$0xff]  ;;  %v85_v22 = vld [vmem:[%s971_s2 + $0x1f0] sm:$0xff]  ;;  %v559_v26 = vpack.c.bf16 %v54_v20, %v53_v19 }
  0x15   :  { %550 = vmatpush3.bf16.msra.mxu0 %v549_v62  ;;  %v68_v17 = vld [vmem:[%s971_s2 + $0x168] sm:$0xff]  ;;  %v86_v23 = vld [vmem:[%s971_s2 + $0x1f8] sm:$0xff]  ;;  %260 = vmatprep.mubr.f32.mxu1 %v20_v21  ;;  %v557_v24 = vpack.c.bf16 %v36_v15, %v35_v11  ;;  %v37_v27 = vld [vmem:[%s971_s2 + $0x70] sm:$0xff] }
  0x16   :  { %552 = vmatprep.subr.bf16.mxu0 %v551_v0  ;;  %v589_v25 = vpack.c.bf16 %v68_v17, %v67_v16  ;;  %v38_v28 = vld [vmem:[%s971_s2 + $0x78] sm:$0xff]  ;;  %v69_v29 = vld [vmem:[%s971_s2 + $0x170] sm:$0xff]  ;;  %v591_v30 = vpack.c.bf16 %v86_v23, %v85_v22  ;;  %v103_v32 = vld [vmem:[%s971_s2 + $0x280] sm:$0xff]  ;;  %v629_v22 = vmov 0.0  }
  0x17   :  { %582 = vmatpush3.bf16.msra.mxu1 %v581_v63  ;;  %v70_v31 = vld [vmem:[%s971_s2 + $0x178] sm:$0xff]  ;;  %v104_v33 = vld [vmem:[%s971_s2 + $0x288] sm:$0xff]  ;;  %v561_v34 = vpack.c.bf16 %v38_v28, %v37_v27  ;;  %v87_v37 = vld [vmem:[%s971_s2 + $0x200] sm:$0xff] }
  0x18   :  { %584 = vmatprep.subr.bf16.mxu1 %v583_v4  ;;  %v593_v35 = vpack.c.bf16 %v70_v31, %v69_v29  ;;  %v595_v36 = vpack.c.bf16 %v104_v33, %v103_v32  ;;  %v88_v38 = vld [vmem:[%s971_s2 + $0x208] sm:$0xff]  ;;  %v105_v39 = vld [vmem:[%s971_s2 + $0x290] sm:$0xff]  ;;  %v106_v40 = vld [vmem:[%s971_s2 + $0x298] sm:$0xff] }
  0x19   :  { %554 = vmatpush3.bf16.msra.mxu0 %v553_v10  ;;  %v17_v41 = vld [vmem:[%s972_s1] sm:$0xff]  ;;  %v597_v42 = vpack.c.bf16 %v88_v38, %v87_v37  ;;  %v19_v43 = vld [vmem:[%s972_s1 + $0x10] sm:$0xff]  ;;  %v599_v44 = vpack.c.bf16 %v106_v40, %v105_v39  ;;  %v90_v46 = vld [vmem:[%s971_s2 + $0x218] sm:$0xff] }
  0x1a   :  { %556 = vmatprep.subr.bf16.mxu0 %v555_v14  ;;  %v89_v45 = vld [vmem:[%s971_s2 + $0x210] sm:$0xff]  ;;  %v107_v47 = vld [vmem:[%s971_s2 + $0x2a0] sm:$0xff]  ;;  %v108_v48 = vld [vmem:[%s971_s2 + $0x2a8] sm:$0xff] }
  0x1b   :  { %586 = vmatpush3.bf16.msra.mxu1 %v585_v13  ;;  %v22_v49 = vld [vmem:[%s972_s1 + $0x28] sm:$0xff]  ;;  %v601_v50 = vpack.c.bf16 %v90_v46, %v89_v45  ;;  %v603_v51 = vpack.c.bf16 %v108_v48, %v107_v47  ;;  %v91_v52 = vld [vmem:[%s971_s2 + $0x220] sm:$0xff]  ;;  %v109_v54 = vld [vmem:[%s971_s2 + $0x2b0] sm:$0xff] }
  0x1c   :  { %588 = vmatprep.subr.bf16.mxu1 %v587_v18  ;;  %v92_v53 = vld [vmem:[%s971_s2 + $0x228] sm:$0xff]  ;;  %v110_v55 = vld [vmem:[%s971_s2 + $0x2b8] sm:$0xff]  ;;  %v93_v58 = vld [vmem:[%s971_s2 + $0x230] sm:$0xff] }
  0x1d   :  { %558 = vmatpush3.bf16.msra.mxu0 %v557_v24  ;;  %v605_v56 = vpack.c.bf16 %v92_v53, %v91_v52  ;;  %v607_v57 = vpack.c.bf16 %v110_v55, %v109_v54  ;;  %v94_v59 = vld [vmem:[%s971_s2 + $0x238] sm:$0xff]  ;;  %v111_v60 = vld [vmem:[%s971_s2 + $0x2c0] sm:$0xff]  ;;  %v112_v61 = vld [vmem:[%s971_s2 + $0x2c8] sm:$0xff] }
  0x1e   :  { %560 = vmatprep.subr.bf16.mxu0 %v559_v26  ;;  %v609_v62 = vpack.c.bf16 %v94_v59, %v93_v58  ;;  %v611_v63 = vpack.c.bf16 %v112_v61, %v111_v60  ;;  %v95_v0 = vld [vmem:[%s971_s2 + $0x240] sm:$0xff]  ;;  %v96_v1 = vld [vmem:[%s971_s2 + $0x248] sm:$0xff]  ;;  %v113_v2 = vld [vmem:[%s971_s2 + $0x2d0] sm:$0xff] }
  0x1f   :  { %590 = vmatpush3.bf16.msra.mxu1 %v589_v25  ;;  %v114_v3 = vld [vmem:[%s971_s2 + $0x2d8] sm:$0xff]  ;;  %v613_v4 = vpack.c.bf16 %v96_v1, %v95_v0  ;;  %v97_v6 = vld [vmem:[%s971_s2 + $0x250] sm:$0xff]  ;;  %v115_v8 = vld [vmem:[%s971_s2 + $0x2e0] sm:$0xff] }
  0x20   :  { %592 = vmatprep.subr.bf16.mxu1 %v591_v30  ;;  %v615_v5 = vpack.c.bf16 %v114_v3, %v113_v2  ;;  %v98_v7 = vld [vmem:[%s971_s2 + $0x258] sm:$0xff]  ;;  %v116_v9 = vld [vmem:[%s971_s2 + $0x2e8] sm:$0xff]  ;;  %v99_v12 = vld [vmem:[%s971_s2 + $0x260] sm:$0xff] }
  0x21   :  { %562 = vmatpush3.bf16.msra.mxu0 %v561_v34  ;;  %v617_v10 = vpack.c.bf16 %v98_v7, %v97_v6  ;;  %v619_v11 = vpack.c.bf16 %v116_v9, %v115_v8  ;;  %v100_v13 = vld [vmem:[%s971_s2 + $0x268] sm:$0xff]  ;;  %v117_v14 = vld [vmem:[%s971_s2 + $0x2f0] sm:$0xff]  ;;  %v118_v15 = vld [vmem:[%s971_s2 + $0x2f8] sm:$0xff] }
  0x22   :  { %596 = vmatprep.subr.bf16.mxu0 %v595_v36  ;;  %v621_v16 = vpack.c.bf16 %v100_v13, %v99_v12  ;;  %v623_v17 = vpack.c.bf16 %v118_v15, %v117_v14  ;;  %v101_v18 = vld [vmem:[%s971_s2 + $0x270] sm:$0xff]  ;;  %v102_v19 = vld [vmem:[%s971_s2 + $0x278] sm:$0xff]  ;;  %v21_v21 = vld [vmem:[%s972_s1 + $0x20] sm:$0xff] }
  0x23   :  { %594 = vmatpush3.bf16.msra.mxu1 %v593_v35  ;;  %v625_v20 = vpack.c.bf16 %v102_v19, %v101_v18  ;;  %v417_v24 = vld [vmem:[%s973_s3] ss:$0 sm:$0xff] }
  0x24   :  { %191 = vmatmul.mubr.f32.vlgmr.msra.gmra.mrb[0].mxu0 %v17_v41  ;;  %526 = vmatprep.subr.mxu1 %v629_v22  ;;  %v336_v36 = vld [vmem:[%s974_s0] sm:$0xff] }
  0x25   :  { %598 = vmatpush3.bf16.msra.mxu0 %v597_v42  ;;  %330 = vmatprep.mubr.f32.mxu0 %v22_v49 }
  0x26   :  { %261 = vmatmul.mubr.f32.vlgmr.msra.gmra.mrb[0].mxu1 %v19_v43  ;;  %600 = vmatprep.subr.bf16.mxu0 %v599_v44 }
  0x27   :  { %528 = vmatprep.mubr.msk.f32.mxu1 %vm630_vm0, %v629_v22 }
  0x29   :  { %602 = vmatpush3.bf16.msra.mxu0 %v601_v50 }
  0x2a   :  { %604 = vmatprep.subr.bf16.mxu0 %v603_v51 }
  0x2d   :  { %606 = vmatpush3.bf16.msra.mxu0 %v605_v56 }
  0x2e   :  { %608 = vmatprep.subr.bf16.mxu0 %v607_v57 }
  0x31   :  { %610 = vmatpush3.bf16.msra.mxu0 %v609_v62 }
  0x32   :  { %612 = vmatprep.subr.bf16.mxu0 %v611_v63 }
  0x35   :  { %614 = vmatpush3.bf16.msra.mxu0 %v613_v4 }
  0x36   :  { %616 = vmatprep.subr.bf16.mxu0 %v615_v5 }
  0x39   :  { %618 = vmatpush3.bf16.msra.mxu0 %v617_v10 }
  0x3a   :  { %620 = vmatprep.subr.bf16.mxu0 %v619_v11 }
  0x3d   :  { %622 = vmatpush3.bf16.msra.mxu0 %v621_v16 }
  0x3e   :  { %624 = vmatprep.subr.bf16.mxu0 %v623_v17 }
  0x41   :  { %626 = vmatpush3.bf16.msra.mxu0 %v625_v20 }
  0x44   :  { %331 = vmatmul.mubr.f32.vlgmr.msra.gmra.mrb[2].mxu0 %v21_v21 }
  0xf7   :  { %v451_v23 = vpop.f32.mrb[0].mxu0 }
  0xf8   :  { %v452_v25 = vpop.f32.mrb[1].mxu0 }
  0xf9   :  { %v486_v26 = vpop.f32.mrb[0].mxu1  ;;  %v453_v27 = vadd.f32 %v452_v25, %v451_v23 }
  0xfa   :  { %v487_v28 = vpop.f32.mrb[1].mxu1 }
  0xfb   :  { %v488_v29 = vadd.f32 %v487_v28, %v486_v26  ;;  %v193_v30 = vadd.f32 %v453_v27, %v417_v24 }
  0xfd   :  { %v263_v31 = vadd.f32 %v488_v29, %v193_v30 }
 0x117   :  { %v521_v32 = vpop.f32.mrb[2].mxu0 }
 0x118   :  { %v522_v33 = vpop.f32.mrb[3].mxu0 }
 0x119   :  { %v523_v34 = vadd.f32 %v522_v33, %v521_v32 }
 0x11b   :  { %v333_v35 = vadd.f32 %v523_v34, %v263_v31 }
 0x11d   :  { %527 = vmatpush3.msra.mxu1 %v333_v35 }
 0x11e   :  { %529 = vmatmul.mubr.msk.f32.vlgmr.msra.gmra.mrb[2].mxu1 %vm337_vm1, %v336_v36 }
 0x1f1   :  { %v407_v37 = vpop.f32.mrb[2].mxu1 }
 0x1f2   :  { %412 = vst.msk [vmem:[%s975_s4] sm:$0xff] %vm411_vm2, %v407_v37  ;;  %v530_v38 = vpop.f32.mrb[3].mxu1 }

</bundles_post_ra>
